<compile_context>
chip_gen: v7x
topology: tpu7x:2x2x1
jax: 0.10.0
libtpu: 0.0.40
codegen_flags: <defaults>
</compile_context>

<pallas_src>
import functools

import jax
import jax.numpy as jnp
from jax.experimental import pallas as pl
from jax.experimental.pallas import tpu as pltpu

GN_EPS = 1e-5


def sa_kernel(x_ref, p_ref, o_ref):
    """One grid step: TB batches x one channel half (C2 = c//2 channels).

    x_ref : (TB, 1, C2, S)  activations for this half
    p_ref : (1, C2, 4)      per-channel coeffs [cw, cb, sw*gw, sw*gb+sb]
    o_ref : (TB, C2, S)     fused-shuffle layout (or (TB,1,C2,S) fallback)
    """
    x = x_ref[:, 0, :, :]                                    # (TB, C2, S)
    inv_s = 1.0 / x.shape[-1]

    p = p_ref[0]                                             # (C2, 4)
    cw = p[:, 0:1]
    cb = p[:, 1:2]
    a_gn = p[:, 2:3]                                         # sw*gw (0 on chan-branch)
    b_gn = p[:, 3:4]                                         # sw*gb+sb (0 on chan-branch)

    # Single-pass per-channel statistics over the spatial axis.
    mean = jnp.sum(x, axis=-1, keepdims=True) * inv_s        # (TB, C2, 1)
    ex2 = jnp.sum(x * x, axis=-1, keepdims=True) * inv_s
    var = jnp.maximum(ex2 - mean * mean, 0.0)
    r = jax.lax.rsqrt(var + GN_EPS)                          # (TB, C2, 1)

    # Unified gate: y = x * sigmoid(alpha*x + beta)
    #   channel-attention channels: alpha = 0,       beta = cw*mean + cb
    #   GroupNorm channels:         alpha = a_gn*r,  beta = b_gn - a_gn*r*mean
    alpha = a_gn * r
    beta = cw * mean + cb + b_gn - alpha * mean

    y = x * jax.nn.sigmoid(alpha * x + beta)
    o_ref[...] = y.reshape(o_ref.shape).astype(o_ref.dtype)


def _build_channel_coeffs(params, groups, cpg, dtype):
    """Stacked per-channel coefficients in pre-shuffle order -> (2, c//2, 4)."""
    cw, cb, sw, sb, gw, gb = (jnp.asarray(p, dtype).reshape(cpg) for p in params)
    zeros = jnp.zeros((cpg,), dtype)
    # Per-group channel layout: [cpg channel-attention | cpg GroupNorm].
    cw_g = jnp.concatenate([cw, zeros])
    cb_g = jnp.concatenate([cb, zeros])
    a_g = jnp.concatenate([zeros, sw * gw])                  # folded GN affine
    b_g = jnp.concatenate([zeros, sw * gb + sb])
    p_grp = jnp.stack([cw_g, cb_g, a_g, b_g], axis=-1)       # (2*cpg, 4)
    p_all = jnp.tile(p_grp, (groups, 1))                     # (c, 4)
    return p_all.reshape(2, groups * cpg, 4)                 # split into halves


def sa_layer_forward(x, params, groups=4):
    """x: (b, c, h, w) float32, NCHW like the PyTorch module."""
    b, c, h, w = x.shape
    assert c % (2 * groups) == 0, "channels must be divisible by 2*groups"
    cpg = c // (2 * groups)
    c2 = c // 2
    s = h * w

    coeffs = _build_channel_coeffs(params, groups, cpg, x.dtype)

    # Free (contiguous) view: (batch, channel-half, channels-per-half, spatial).
    x_r = x.reshape(b, 2, c2, s)

    # Batch tile: aim for a few MiB per step so grid-step overhead is
    # amortised, while double-buffered in+out stays well inside the smallest
    # scoped-VMEM budget (v7x: 64 MiB physical, 32 MiB scoped default).
    bytes_per_batch = c2 * s * x.dtype.itemsize
    target = 4 * 1024 * 1024
    tb = max(1, min(b, target // max(bytes_per_batch, 1)))
    while b % tb:
        tb -= 1
    block_bytes = tb * bytes_per_batch
    vmem_limit = int(min(max(4 * block_bytes + (16 << 20), 32 << 20), 48 << 20))

    in_spec = pl.BlockSpec((tb, 1, c2, s), lambda t, i: (i, t, 0, 0))
    par_spec = pl.BlockSpec((1, c2, 4), lambda t, i: (t, 0, 0))

    fuse_shuffle = (s % 128 == 0)
    if fuse_shuffle:
        # channel_shuffle(groups=2) fused into the output layout:
        # out[b, j, t, :] holds pre-shuffle channel t*c2 + j, i.e. shuffled
        # channel 2*j + t -> final reshape to (b, c, h, w) is contiguous.
        out_shape = jax.ShapeDtypeStruct((b, c2, 2 * s), x.dtype)
        out_spec = pl.BlockSpec((tb, c2, s), lambda t, i: (i, 0, t))
    else:
        # TODO(synk): pad S to a multiple of 128 (masking the pad out of the
        # stats) so the shuffled store stays lane-aligned; for now fall back
        # to a post-kernel shuffle when S is not 128-aligned.
        out_shape = jax.ShapeDtypeStruct((b, 2, c2, s), x.dtype)
        out_spec = pl.BlockSpec((tb, 1, c2, s), lambda t, i: (i, t, 0, 0))

    out = pl.pallas_call(
        sa_kernel,
        out_shape=out_shape,
        grid=(2, b // tb),
        in_specs=[in_spec, par_spec],
        out_specs=out_spec,
        compiler_params=pltpu.CompilerParams(
            dimension_semantics=("parallel", "parallel"),
            vmem_limit_bytes=vmem_limit),
    )(x_r, coeffs)

    if fuse_shuffle:
        return out.reshape(b, c, h, w)
    out = out.reshape(b, 2, c2, h, w).transpose(0, 2, 1, 3, 4)
    return out.reshape(b, c, h, w)


def ref_forward(x, params, groups=4):
    """Pure-JAX reference mirroring the PyTorch forward, for validation."""
    cw, cb, sw, sb, gw, gb = params
    b, c, h, w = x.shape
    xr = x.reshape(b * groups, -1, h, w)
    cpg = xr.shape[1] // 2
    x0, x1 = xr[:, :cpg], xr[:, cpg:]

    bc = lambda p: p[None, :, None, None]

    xn = jnp.mean(x0, axis=(2, 3), keepdims=True)
    xn = bc(cw) * xn + bc(cb)
    xn = x0 * jax.nn.sigmoid(xn)

    mean = jnp.mean(x1, axis=(2, 3), keepdims=True)
    var = jnp.mean((x1 - mean) ** 2, axis=(2, 3), keepdims=True)
    xhat = (x1 - mean) / jnp.sqrt(var + GN_EPS)
    xs = xhat * bc(gw) + bc(gb)
    xs = bc(sw) * xs + bc(sb)
    xs = x1 * jax.nn.sigmoid(xs)

    out = jnp.concatenate([xn, xs], axis=1).reshape(b, c, h, w)
    out = out.reshape(b, 2, c // 2, h, w).transpose(0, 2, 1, 3, 4)
    return out.reshape(b, c, h, w)


if __name__ == "__main__":
    groups = 4
    b, c, h, w = 2, 16, 16, 16          # channel=16, groups=4 -> cpg=2
    cpg = c // (2 * groups)

    key = jax.random.PRNGKey(0)
    kx, kp = jax.random.split(key)
    x = jax.random.normal(kx, (b, c, h, w), dtype=jnp.float32)

    # Deterministic parameter init (module defaults would be 0/1 constants;
    # small random values are used so every code path is exercised).
    pk = jax.random.split(kp, 6)
    cweight = 0.5 * jax.random.normal(pk[0], (cpg,), dtype=jnp.float32)
    cbias = 1.0 + 0.1 * jax.random.normal(pk[1], (cpg,), dtype=jnp.float32)
    sweight = 0.5 * jax.random.normal(pk[2], (cpg,), dtype=jnp.float32)
    sbias = 1.0 + 0.1 * jax.random.normal(pk[3], (cpg,), dtype=jnp.float32)
    gn_gamma = 1.0 + 0.1 * jax.random.normal(pk[4], (cpg,), dtype=jnp.float32)
    gn_beta = 0.1 * jax.random.normal(pk[5], (cpg,), dtype=jnp.float32)
    params = (cweight, cbias, sweight, sbias, gn_gamma, gn_beta)

    fwd = jax.jit(functools.partial(sa_layer_forward, groups=groups))
    out = jax.block_until_ready(fwd(x, params))
    ref = jax.block_until_ready(ref_forward(x, params, groups=groups))

    assert out.shape == (b, c, h, w)
    assert jnp.allclose(out, ref, atol=1e-5, rtol=1e-5), "mismatch vs reference"

    print("KERNEL_OK")
</pallas_src>

<mosaic_0001>
module attributes {stable_mosaic.version = 11 : i64} {
  func.func @sa_kernel(%arg0: i32, %arg1: i32, %arg2: memref<2x1x8x256xf32, #tpu.memory_space<vmem>>, %arg3: memref<1x8x4xf32, #tpu.memory_space<vmem>>, %arg4: memref<2x8x256xf32, #tpu.memory_space<vmem>>) attributes {dimension_semantics = [#tpu.dimension_semantics<parallel>, #tpu.dimension_semantics<parallel>], iteration_bounds = array<i64: 2, 1>, scalar_prefetch = 0 : i64, scratch_operands = 0 : i64, tpu.core_type = #tpu.core_type<tc>, window_params = [{transform_indices = @transform_0, window_bounds = array<i64: 2, 1, 8, 256>}, {transform_indices = @transform_1, window_bounds = array<i64: 1, 8, 4>}, {transform_indices = @transform_2, window_bounds = array<i64: 2, 8, 256>}]} {
    %c0 = arith.constant 0 : index
    %c0_0 = arith.constant 0 : index
    %c0_1 = arith.constant 0 : index
    %c0_2 = arith.constant 0 : index
    %0 = vector.load %arg2[%c0, %c0_0, %c0_1, %c0_2] : memref<2x1x8x256xf32, #tpu.memory_space<vmem>>, vector<2x1x8x256xf32>
    %1 = vector.shape_cast %0 : vector<2x1x8x256xf32> to vector<2x8x256xf32>
    %c0_3 = arith.constant 0 : index
    %c0_4 = arith.constant 0 : index
    %c0_5 = arith.constant 0 : index
    %2 = vector.load %arg3[%c0_3, %c0_4, %c0_5] : memref<1x8x4xf32, #tpu.memory_space<vmem>>, vector<1x8x4xf32>
    %3 = vector.shape_cast %2 : vector<1x8x4xf32> to vector<8x4xf32>
    %4 = vector.extract_strided_slice %3 {offsets = [0, 0], sizes = [8, 1], strides = [1, 1]} : vector<8x4xf32> to vector<8x1xf32>
    %5 = vector.extract_strided_slice %3 {offsets = [0, 1], sizes = [8, 1], strides = [1, 1]} : vector<8x4xf32> to vector<8x1xf32>
    %6 = vector.extract_strided_slice %3 {offsets = [0, 2], sizes = [8, 1], strides = [1, 1]} : vector<8x4xf32> to vector<8x1xf32>
    %7 = vector.extract_strided_slice %3 {offsets = [0, 3], sizes = [8, 1], strides = [1, 1]} : vector<8x4xf32> to vector<8x1xf32>
    %cst = arith.constant dense<0.000000e+00> : vector<2x8xf32>
    %8 = vector.multi_reduction <add>, %1, %cst [2] : vector<2x8x256xf32> to vector<2x8xf32>
    %9 = vector.shape_cast %8 : vector<2x8xf32> to vector<2x8x1xf32>
    %cst_6 = arith.constant 3.906250e-03 : f32
    %10 = vector.broadcast %cst_6 : f32 to vector<2x8x1xf32>
    %11 = arith.mulf %9, %10 : vector<2x8x1xf32>
    %12 = arith.mulf %1, %1 : vector<2x8x256xf32>
    %cst_7 = arith.constant dense<0.000000e+00> : vector<2x8xf32>
    %13 = vector.multi_reduction <add>, %12, %cst_7 [2] : vector<2x8x256xf32> to vector<2x8xf32>
    %14 = vector.shape_cast %13 : vector<2x8xf32> to vector<2x8x1xf32>
    %cst_8 = arith.constant 3.906250e-03 : f32
    %15 = vector.broadcast %cst_8 : f32 to vector<2x8x1xf32>
    %16 = arith.mulf %14, %15 : vector<2x8x1xf32>
    %17 = arith.mulf %11, %11 : vector<2x8x1xf32>
    %18 = arith.subf %16, %17 : vector<2x8x1xf32>
    %cst_9 = arith.constant 0.000000e+00 : f32
    %19 = vector.broadcast %cst_9 : f32 to vector<2x8x1xf32>
    %20 = arith.maximumf %18, %19 : vector<2x8x1xf32>
    %cst_10 = arith.constant 9.99999974E-6 : f32
    %21 = vector.broadcast %cst_10 : f32 to vector<2x8x1xf32>
    %22 = arith.addf %20, %21 : vector<2x8x1xf32>
    %23 = math.rsqrt %22 : vector<2x8x1xf32>
    %24 = vector.shape_cast %6 : vector<8x1xf32> to vector<1x8x1xf32>
    %25 = vector.broadcast %24 : vector<1x8x1xf32> to vector<2x8x1xf32>
    %26 = arith.mulf %25, %23 : vector<2x8x1xf32>
    %27 = vector.shape_cast %4 : vector<8x1xf32> to vector<1x8x1xf32>
    %28 = vector.broadcast %27 : vector<1x8x1xf32> to vector<2x8x1xf32>
    %29 = arith.mulf %28, %11 : vector<2x8x1xf32>
    %30 = vector.shape_cast %5 : vector<8x1xf32> to vector<1x8x1xf32>
    %31 = vector.broadcast %30 : vector<1x8x1xf32> to vector<2x8x1xf32>
    %32 = arith.addf %29, %31 : vector<2x8x1xf32>
    %33 = vector.shape_cast %7 : vector<8x1xf32> to vector<1x8x1xf32>
    %34 = vector.broadcast %33 : vector<1x8x1xf32> to vector<2x8x1xf32>
    %35 = arith.addf %32, %34 : vector<2x8x1xf32>
    %36 = arith.mulf %26, %11 : vector<2x8x1xf32>
    %37 = arith.subf %35, %36 : vector<2x8x1xf32>
    %38 = vector.broadcast %26 : vector<2x8x1xf32> to vector<2x8x256xf32>
    %39 = arith.mulf %38, %1 : vector<2x8x256xf32>
    %40 = vector.broadcast %37 : vector<2x8x1xf32> to vector<2x8x256xf32>
    %41 = arith.addf %39, %40 : vector<2x8x256xf32>
    %42 = arith.negf %41 : vector<2x8x256xf32>
    %43 = math.exp %42 : vector<2x8x256xf32>
    %cst_11 = arith.constant 1.000000e+00 : f32
    %44 = vector.broadcast %cst_11 : f32 to vector<2x8x256xf32>
    %45 = arith.addf %44, %43 : vector<2x8x256xf32>
    %46 = arith.divf %44, %45 : vector<2x8x256xf32>
    %47 = arith.mulf %1, %46 : vector<2x8x256xf32>
    %c0_12 = arith.constant 0 : index
    %c0_13 = arith.constant 0 : index
    %c0_14 = arith.constant 0 : index
    %48 = vector.load %arg4[%c0_12, %c0_13, %c0_14] : memref<2x8x256xf32, #tpu.memory_space<vmem>>, vector<2x8x256xf32>
    tpu.vector_store %arg4[%c0_12, %c0_13, %c0_14], %47 {strides = array<i32>} : memref<2x8x256xf32, #tpu.memory_space<vmem>>, vector<2x8x256xf32>,
    return
  }
  func.func @transform_0(%arg0: i32, %arg1: i32) -> (i32, i32, i32, i32) {
    %c0_i32 = arith.constant 0 : i32
    %c0_i32_0 = arith.constant 0 : i32
    %c0_i32_1 = arith.constant 0 : i32
    return %arg1, %arg0, %c0_i32, %c0_i32_0 : i32, i32, i32, i32
  }
  func.func @transform_1(%arg0: i32, %arg1: i32) -> (i32, i32, i32) {
    %c0_i32 = arith.constant 0 : i32
    %c0_i32_0 = arith.constant 0 : i32
    %c0_i32_1 = arith.constant 0 : i32
    return %arg0, %c0_i32, %c0_i32_0 : i32, i32, i32
  }
  func.func @transform_2(%arg0: i32, %arg1: i32) -> (i32, i32, i32) {
    %c0_i32 = arith.constant 0 : i32
    %c0_i32_0 = arith.constant 0 : i32
    return %arg1, %c0_i32, %arg0 : i32, i32, i32
  }
}

</mosaic_0001>

<bundles_post_ra>
// kernel: sa_layer_forward.1
= control target key start
LH: loop header
LB: loop body
LE: loop exit
PB: predicated region body
PF: predicated region fallthrough
CT: control target
= control target key end

     0   :  { %s595_s9 = smov 0   ;;  %s597_s10 = smov 0   ;;  %s704_s0 = inlined_call_operand.vmem [shape: f32[2,2,8,256], index: 0, kind: input, shape index: {}]   ;;  %s705_s1 = inlined_call_operand.vmem [shape: f32[2,8,4], index: 1, kind: input, shape index: {}]   ;;  %s706_s2 = inlined_call_operand.vmem [shape: f32[2,8,512], index: 2, kind: output, shape index: {}]  }
   0x1   :  { %s599_s11 = smov 0   ;;  %s601_s12 = smov 0  }
   0x2   :  { %s603_s13 = smov 0  }
   0x3 LB: > { %s24_s14 = sadd.s32 1, %s569_s12  ;;  %s444_s15 = sadd.s32 4294967295, %s573_s13   ;;  %s573_s13 = sphi %s603_s13, %s12_s13   ;;  %s569_s12 = sphi %s601_s12, %s711_s12   ;;  %s565_s11 = sphi %s599_s11, %s710_s11   ;;  %s561_s10 = sphi %s597_s10, %s709_s10   ;;  %s557_s9 = sphi %s595_s9, %s708_s9  }
   0x4   : > { %p26_p0 = scmp.ge.s32.totalorder %s24_s14, 2  ;;  %p40_p1 = scmp.ne.s32.totalorder %s561_s10, %s557_s9 }
   0x5   : > { %p41_p2 = scmp.eq.s32.totalorder %s573_s13, 0  ;;  %p98_p4 = scmp.eq.s32.totalorder %s444_s15, 1 }
   0x6   : > { %s713_s14 = smov (%p26_p0, %s24_s14), 0  ;;  %s33_s17 = sadd.s32 1, %s561_s10 }
   0x7   : > { %p42_p3 = por %p41_p2, %p40_p1  ;;  %s29_s16 = ssub.s32 %s569_s12, %s713_s14 }
   0x8   : > { %p31_p5 = scmp.eq.s32.totalorder %s29_s16, 0  ;;  %p630_p6 = por %p98_p4, %p40_p1 }
   0x9   : > { %p447_p7 = scmp.ge.s32.totalorder %s573_s13, 2 }
   0xa   : > { %s635_s19 = scalar_select %p31_p5, %s561_s10, %s33_s17  }
   0xb   : > { %120 = sbr.rel (%p447_p7) target bundleno = 25 (0x19), region = 16 }
  0x12   : > { %123 = sbr.rel (!%p42_p3) target bundleno = 25 (0x19), region = 20  ;;  %s125_s20 = sand.u32 (%p42_p3), 1, %s561_s10  }
  0x13   : > { %s464_s21 = sshll.u32 (%p42_p3), %s569_s12, 4  ;;  %s448_s22 = sshll.u32 (%p42_p3), %s125_s20, 5 }
  0x14   : > { %s133_s25 = scalar_lea.vmem (%p42_p3), %s704_s0, %s464_s21  ;;  %s127_s26 = scalar_lea.vmem (%p42_p3), [#allocation2], %s448_s22 }
  0x15   : > { %v146_v0 = vld [vmem:[%s133_s25] sm:$0xff] (%p42_p3)  ;;  %v148_v1 = vld [vmem:[%s133_s25 + $0x8] sm:$0xff] (%p42_p3) }
  0x16   : > { %v150_v2 = vld [vmem:[%s133_s25 + $0x20] sm:$0xff] (%p42_p3)  ;;  %147 = vst [vmem:[%s127_s26] sm:$0xff] (%p42_p3), %v146_v0  ;;  %149 = vst [vmem:[%s127_s26 + $0x8] sm:$0xff] (%p42_p3), %v148_v1  ;;  %v152_v3 = vld [vmem:[%s133_s25 + $0x28] sm:$0xff] (%p42_p3) }
  0x17   : > { %151 = vst [vmem:[%s127_s26 + $0x10] sm:$0xff] (%p42_p3), %v150_v2  ;;  %153 = vst [vmem:[%s127_s26 + $0x18] sm:$0xff] (%p42_p3), %v152_v3 }
  0x19 PF: > { %p451_p8 = scmp.ge.s32.totalorder %s573_s13, 1  ;;  %p165_p9 = scmp.lt.s32.totalorder %s573_s13, 3 }
  0x1b   : > { %p166_p10 = pnand %p451_p8, %p165_p9 }
  0x1c   : > { %s172_s27 = sand.u32 (!%p166_p10), 1, %s557_s9   ;;  %p197_p11 = scmp.lt.s32.totalorder (!%p166_p10), %s565_s11, 1  ;;  %v577_v17 = vmov (!%p166_p10), 2   ;;  %v579_v40 = vmov (!%p166_p10), 0  }
  0x1d   : > { %169 = sbr.rel (%p166_p10) target bundleno = 490 (0x1ea), region = 47  ;;  %s646_s28 = sshll.u32 (!%p166_p10), %s172_s27, 5  ;;  %511 = vset.pattern.permute.xlu0 (!%p166_p10), %v577_v17  ;;  %512 = vset.pattern.permute.xlu1 (!%p166_p10), %v577_v17 }
  0x1e   : > { %s174_s29 = scalar_lea.vmem (!%p166_p10), [#allocation2], %s646_s28  ;;  %s575_s7 = smov (!%p166_p10), 125  }
  0x1f   : > { %v649_v4 = vld [vmem:[%s174_s29] sm:$0xff] (!%p166_p10)  ;;  %v651_v5 = vld [vmem:[%s174_s29 + $0x8] sm:$0xff] (!%p166_p10)  ;;  %v653_v6 = vld [vmem:[%s174_s29 + $0x10] sm:$0xff] (!%p166_p10)  ;;  %s576_s8 = smov (!%p166_p10), 127   ;;  %s578_s9 = smov (!%p166_p10), 126  }
  0x20   : > { %v208_v7 = vadd.f32 (!%p166_p10), %v651_v5, %v649_v4  ;;  %v216_v8 = vmul.f32 (!%p166_p10), %v649_v4, %v649_v4  ;;  %v217_v9 = vmul.f32 (!%p166_p10), %v651_v5, %v651_v5  ;;  %v661_v10 = vld [vmem:[%s174_s29 + $0x18] sm:$0xff] (!%p166_p10)  ;;  %v218_v11 = vmul.f32 (!%p166_p10), %v653_v6, %v653_v6  ;;  %s195_s15 = scalar_lea.vmem (!%p166_p10), [#allocation3], %s646_s28 }
  0x21   : > { %v219_v12 = vmul.f32 (!%p166_p10), %v661_v10, %v661_v10  ;;  %v211_v14 = vadd.f32 (!%p166_p10), %v661_v10, %v653_v6 }
  0x22   : > { %209 = vadd.xlane.f32.xlu0 (!%p166_p10), %v208_v7  ;;  %v220_v13 = vadd.f32 (!%p166_p10), %v217_v9, %v216_v8 }
  0x23   : > { %v223_v15 = vadd.f32 (!%p166_p10), %v219_v12, %v218_v11 }
  0x24   : > { %221 = vadd.xlane.f32.xlu1 %v220_v13  ;;  %s198_s30 = scalar_select %p197_p11, %s565_s11, 1 }
  0x25   : > { %s465_s16 = sshll.u32 (%p630_p6), %s565_s11, 4 }
  0x26   : > { %212 = vadd.xlane.f32.xlu0 %v211_v14  ;;  %s454_s3 = sshll.u32 %s198_s30, 3  ;;  %s337_s21 = scalar_lea.vmem (%p630_p6), %s706_s2, %s465_s16 }
  0x27   : > { %s200_s6 = scalar_lea.vmem %s705_s1, %s454_s3 }
  0x28   : > { %224 = vadd.xlane.f32.xlu1 %v223_v15  ;;  %v207_v16 = vld [vmem:[%s200_s6] sm:$0xff] }
  0x39   : > { %248 = vrot.lane.b32.xlu1 %v207_v16, %s575_s7 }
  0x3c   : > { %243 = vrot.lane.b32.xlu0 %v207_v16, %s576_s8 }
  0xaf   : > { %v210_v18 = vpop.xlane.xlu0 %209 }
  0xb0   : > { %v214_v19 = vmul.f32 0.00390625, %v210_v18 }
  0xb1   : > { %v222_v20 = vpop.xlane.xlu1 %221 }
  0xb2   : > { %v226_v21 = vmul.f32 0.00390625, %v222_v20  ;;  %v228_v22 = vmul.f32 %v214_v19, %v214_v19  ;;  %v240_v42 = vmul.f32 %v214_v19, %v207_v16 }
  0xb3   : > { %v213_v23 = vpop.xlane.xlu0 %212 }
  0xb4   : > { %v230_v24 = vsub.f32 %v226_v21, %v228_v22  ;;  %v215_v25 = vmul.f32 0.00390625, %v213_v23 }
  0xb5   : > { %v225_v26 = vpop.xlane.xlu1 %224 }
  0xb6   : > { %v232_v27 = vmax.f32 %v230_v24, 0.0  ;;  %v227_v28 = vmul.f32 0.00390625, %v225_v26  ;;  %v229_v29 = vmul.f32 %v215_v25, %v215_v25  ;;  %v241_v43 = vmul.f32 %v215_v25, %v207_v16 }
  0xb7   : > { %v244_v41 = vpop.permute.xlu0 %243 }
  0xb8   : > { %v234_v30 = vadd.f32 1e-05, %v232_v27  ;;  %v231_v31 = vsub.f32 %v227_v28, %v229_v29  ;;  %v246_v44 = vadd.f32 %v244_v41, %v240_v42  ;;  %v247_v46 = vadd.f32 %v244_v41, %v241_v43 }
  0xb9   : > { %v249_v45 = vpop.permute.xlu1 %248 }
  0xba   : > { %515 = vrsqrt.f32 %v234_v30  ;;  %v233_v32 = vmax.f32 %v231_v31, 0.0  ;;  %v251_v47 = vadd.f32 %v249_v45, %v246_v44  ;;  %v252_v50 = vadd.f32 %v249_v45, %v247_v46 }
  0xbc   : > { %v235_v33 = vadd.f32 1e-05, %v233_v32 }
  0xbe   : > { %517 = vrsqrt.f32 %v235_v33 }
  0xc4   : > { %v516_v34 = vpop.eup %515 }
  0xc5   : > { %v238_v35 = vmul.f32 %v516_v34, %v207_v16 }
  0xc7   : > { %267 = vperm.xlu0 %511, %v238_v35   ;;  %v253_v36 = vmul.f32 %v238_v35, %v214_v19 }
  0xc8   : > { %v518_v37 = vpop.eup %517 }
  0xc9   : > { %257 = vrot.lane.b32.xlu1 %v253_v36, %s578_s9  ;;  %v239_v38 = vmul.f32 %v518_v37, %v207_v16 }
  0xcb   : > { %v254_v39 = vmul.f32 %v239_v38, %v215_v25  ;;  %514 = vset.pattern.permute.xlu0 %v579_v40 }
  0xcd   : > { %259 = vrot.lane.b32.xlu1 %v254_v39, %s578_s9 }
  0xd1   : > { %272 = vperm.xlu1 %512, %v239_v38  }
  0xd5   : > { %513 = vset.pattern.permute.xlu1 %v579_v40 }
 0x13b   : > { %v258_v48 = vpop.permute.xlu1 %257 }
 0x13c   : > { %v263_v49 = vsub.f32 %v251_v47, %v258_v48 }
 0x13e   : > { %281 = vperm.xlu1 %513, %v263_v49  }
 0x13f   : > { %v260_v51 = vpop.permute.xlu1 %259 }
 0x140   : > { %v264_v52 = vsub.f32 %v252_v50, %v260_v51 }
 0x142   : > { %286 = vperm.xlu0 %514, %v264_v52  }
 0x146   : > { %v268_v53 = vpop.permute.xlu0 %267 }
 0x147   : > { %v275_v55 = vmul.f32 %v268_v53, %v649_v4  ;;  %v276_v56 = vmul.f32 %v268_v53, %v651_v5 }
 0x150   : > { %v273_v54 = vpop.permute.xlu1 %272 }
 0x151   : > { %v277_v60 = vmul.f32 %v273_v54, %v653_v6  ;;  %v278_v61 = vmul.f32 %v273_v54, %v661_v10 }
 0x1bd   : > { %v282_v57 = vpop.permute.xlu1 %281 }
 0x1be   : > { %v289_v58 = vadd.f32 %v282_v57, %v275_v55  ;;  %v290_v59 = vadd.f32 %v282_v57, %v276_v56 }
 0x1c0   : > { %v455_v62 = vmul.f32 -1.442695, %v289_v58  ;;  %v456_v63 = vmul.f32 -1.442695, %v290_v59 }
 0x1c1   : > { %v287_v0 = vpop.permute.xlu0 %286 }
 0x1c2   : > { %519 = vpow2.f32 %v455_v62  ;;  %v291_v1 = vadd.f32 %v287_v0, %v277_v60  ;;  %v292_v2 = vadd.f32 %v287_v0, %v278_v61 }
 0x1c3   : > { %521 = vpow2.f32 %v456_v63 }
 0x1c4   : > { %v457_v3 = vmul.f32 -1.442695, %v291_v1  ;;  %v458_v7 = vmul.f32 -1.442695, %v292_v2 }
 0x1c6   : > { %523 = vpow2.f32 %v457_v3 }
 0x1c7   : > { %525 = vpow2.f32 %v458_v7 }
 0x1cc   : > { %v520_v8 = vpop.eup %519 }
 0x1cd   : > { %v522_v9 = vpop.eup %521  ;;  %v305_v11 = vadd.f32 1.0, %v520_v8 }
 0x1ce   : > { %v306_v12 = vadd.f32 1.0, %v522_v9 }
 0x1cf   : > { %527 = vrcp.f32 %v305_v11 }
 0x1d0   : > { %v524_v13 = vpop.eup %523  ;;  %529 = vrcp.f32 %v306_v12 }
 0x1d1   : > { %v526_v14 = vpop.eup %525  ;;  %v307_v15 = vadd.f32 1.0, %v524_v13 }
 0x1d2   : > { %v308_v16 = vadd.f32 1.0, %v526_v14 }
 0x1d3   : > { %531 = vrcp.f32 %v307_v15 }
 0x1d4   : > { %533 = vrcp.f32 %v308_v16 }
 0x1d9   : > { %v528_v17 = vpop.eup %527 }
 0x1da   : > { %v530_v18 = vpop.eup %529  ;;  %v317_v19 = vmul.f32 %v528_v17, %v649_v4 }
 0x1db   : > { %v318_v20 = vmul.f32 %v530_v18, %v651_v5  ;;  %331 = sbr.rel (!%p630_p6) target bundleno = 490 (0x1ea), region = 55 }
 0x1dc   : > { %321 = vst [vmem:[%s195_s15] sm:$0xff] %v317_v19 }
 0x1dd   : > { %v532_v21 = vpop.eup %531  ;;  %322 = vst [vmem:[%s195_s15 + $0x8] sm:$0xff] %v318_v20 }
 0x1de   : > { %v534_v22 = vpop.eup %533  ;;  %v319_v23 = vmul.f32 %v532_v21, %v653_v6 }
 0x1df   : > { %v320_v24 = vmul.f32 %v534_v22, %v661_v10 }
 0x1e0   : > { %323 = vst [vmem:[%s195_s15 + $0x10] sm:$0xff] %v319_v23 }
 0x1e1   : > { %324 = vst [vmem:[%s195_s15 + $0x18] sm:$0xff] %v320_v24 }
 0x1e3   : > { %v350_v25 = vld [vmem:[%s195_s15] sm:$0xff] }
 0x1e4   : > { %v352_v4 = vld [vmem:[%s195_s15 + $0x8] sm:$0xff]  ;;  %351 = vst [vmem:[%s337_s21] sm:$0xff] %v350_v25 }
 0x1e5   : > { %353 = vst [vmem:[%s337_s21 + $0x8] sm:$0xff] %v352_v4 }
 0x1e7   : > { %v354_v26 = vld [vmem:[%s195_s15 + $0x10] sm:$0xff] }
 0x1e8   : > { %v356_v5 = vld [vmem:[%s195_s15 + $0x18] sm:$0xff]  ;;  %355 = vst [vmem:[%s337_s21 + $0x20] sm:$0xff] %v354_v26 }
 0x1e9   : > { %357 = vst [vmem:[%s337_s21 + $0x28] sm:$0xff] %v356_v5 }
 0x1ea PF: > { %s12_s13 = sadd.s32 1, %s573_s13   ;;  %s708_s9 = smov %s561_s10 }
 0x1eb   : > { %p9_p12 = scmp.ge.s32.totalorder %s12_s13, 4   ;;  %s709_s10 = smov %s635_s19 }
 0x1ec   : > { %s710_s11 = smov %s569_s12  ;;  %s711_s12 = smov %s713_s14 }
 0x1ed   :  { %11 = sbr.rel (!%p9_p12) target bundleno = 3 (0x3), region = 112 }

</bundles_post_ra>
